<compile_context>
chip_gen: v5e
topology: v5e:2x2
jax: 0.10.0
libtpu: 0.0.40
codegen_flags: <defaults>
</compile_context>

<pallas_src>
import numpy as np
import jax
import jax.numpy as jnp
from jax import lax
from jax.experimental import pallas as pl
from jax.experimental.pallas import tpu as pltpu


def _round_up(x, m):
    return (x + m - 1) // m * m


# ----------------------------- Pallas kernel --------------------------------
def _make_kernel(out_ch, M_pad, shifts):
    N = out_ch

    def kernel(x_ref, w_ref, b_ref, o_ref):
        # x_ref: (C_pad, L_in)        flattened padded image (compute dtype)
        # w_ref: (ks*ks, 2N, C_pad)   fused standardized weights (signal already *1.8)
        # b_ref: (2N, 1) float32      fused biases (signal bias already *1.8)
        # o_ref: (N, M_pad)           gated output (float32)
        acc = jnp.zeros((2 * N, M_pad), jnp.float32)
        for idx, s in enumerate(shifts):          # implicit im2col: ks*ks lane shifts
            acc = acc + jnp.dot(
                w_ref[idx],                        # (2N, C_pad)
                x_ref[:, pl.ds(s, M_pad)],         # (C_pad, M_pad)
                preferred_element_type=jnp.float32)
        b = b_ref[...]
        sig = acc[:N] + b[:N]                      # f32 gating math (v5e-safe)
        gat = acc[N:] + b[N:]
        o_ref[...] = (sig * jax.nn.sigmoid(gat)).astype(o_ref.dtype)

    return kernel


# ----------------------------- JAX glue --------------------------------------
def standardize_weight(w, gain, eps=1e-4):
    """Scaled weight standardization (matches ScaledWSConv2d.get_weight):
    torch.var_mean default is unbiased (ddof=1); scale = rsqrt(max(var*fan_in, eps))*gain."""
    fan_in = float(np.prod(w.shape[1:]))
    mean = jnp.mean(w, axis=(1, 2, 3), keepdims=True)
    var = jnp.var(w, axis=(1, 2, 3), keepdims=True, ddof=1)
    scale = lax.rsqrt(jnp.maximum(var * fan_in, jnp.asarray(eps, w.dtype))) * gain
    shift = mean * scale
    return w * scale - shift


def gated_ws_conv_padded(x, params, *, ks, stride=1, dilation=1,
                         compute_dtype=jnp.bfloat16):
    """Forward pass of GatedWSConvPadded. x: NCHW float32."""
    B, C, H, W = x.shape
    pad = (ks - 1) * dilation // 2
    xp = jnp.pad(x, ((0, 0), (0, 0), (pad, pad), (pad, pad)), mode="reflect")
    Hp, Wp = H + 2 * pad, W + 2 * pad

    out_ch = params["w_conv"].shape[0]
    N = out_ch

    # Dense (stride-1) output frame: OH1 valid rows, first OW1 columns of each
    # Wp-wide row are valid; the rest is cross-row garbage cropped in the wrapper.
    OH1 = Hp - (ks - 1) * dilation
    OW1 = Wp - (ks - 1) * dilation

    # ---- fused, standardized weights: (ks*ks, 2N, C_pad) -------------------
    w_sig = standardize_weight(params["w_conv"], params["gain_conv"]) * 1.8  # fold 1.8
    w_gat = standardize_weight(params["w_gate"], params["gain_gate"])
    w_all = jnp.concatenate([w_sig, w_gat], axis=0)            # (2N, C, ks, ks)
    C_pad = max(8, _round_up(C, 8))
    if C_pad != C:
        w_all = jnp.pad(w_all, ((0, 0), (0, C_pad - C), (0, 0), (0, 0)))
    wk = w_all.transpose(2, 3, 0, 1).reshape(ks * ks, 2 * N, C_pad)
    wk = wk.astype(compute_dtype)

    b_all = jnp.concatenate([params["b_conv"] * 1.8, params["b_gate"]])
    b_all = b_all.reshape(2 * N, 1).astype(jnp.float32)

    # ---- flattened input for implicit im2col --------------------------------
    M_out = OH1 * Wp                              # dense output frame length
    M_pad = _round_up(M_out, 128)                 # lane-dense matmul/stores
    s_max = (ks - 1) * dilation * (Wp + 1)        # largest tap shift
    L_in = M_pad + s_max
    shifts = [ki * dilation * Wp + kj * dilation
              for ki in range(ks) for kj in range(ks)]

    xf = xp.reshape(B, C, Hp * Wp)
    xf = jnp.pad(xf, ((0, 0), (0, C_pad - C), (0, L_in - Hp * Wp)))
    xf = xf.astype(compute_dtype)

    kernel = _make_kernel(out_ch, M_pad, shifts)

    out_flat = pl.pallas_call(
        kernel,
        out_shape=jax.ShapeDtypeStruct((B, N, M_pad), x.dtype),
        grid_spec=pltpu.PrefetchScalarGridSpec(
            num_scalar_prefetch=0,
            grid=(B,),
            in_specs=[
                pl.BlockSpec((None, C_pad, L_in), lambda b: (b, 0, 0)),
                pl.BlockSpec((ks * ks, 2 * N, C_pad), lambda b: (0, 0, 0)),
                pl.BlockSpec((2 * N, 1), lambda b: (0, 0)),
            ],
            out_specs=pl.BlockSpec((None, N, M_pad), lambda b: (b, 0, 0)),
        ),
        compiler_params=pltpu.CompilerParams(
            dimension_semantics=("parallel",),
            vmem_limit_bytes=32 * 1024 * 1024),
    )(xf, wk, b_all)

    # crop the dense frame back to the valid conv output; result is already NCHW.
    out = out_flat[:, :, :M_out].reshape(B, N, OH1, Wp)[:, :, :, :OW1]
    if stride != 1:
        # TODO(synk): stride>1 is handled by subsampling the dense stride-1 frame
        # (correct but computes stride^2 extra outputs in the kernel).
        out = out[:, :, ::stride, ::stride]
    return out


# ----------------------------- Reference (for self-check) -------------------
def reference_forward(x, params, *, ks, stride=1, dilation=1):
    pad = (ks - 1) * dilation // 2
    xp = jnp.pad(x, ((0, 0), (0, 0), (pad, pad), (pad, pad)), mode="reflect")
    w_sig = standardize_weight(params["w_conv"], params["gain_conv"])
    w_gat = standardize_weight(params["w_gate"], params["gain_gate"])
    dn = lax.conv_dimension_numbers(xp.shape, w_sig.shape, ("NCHW", "OIHW", "NCHW"))
    sig = lax.conv_general_dilated(xp, w_sig, (stride, stride), "VALID",
                                   rhs_dilation=(dilation, dilation),
                                   dimension_numbers=dn)
    gat = lax.conv_general_dilated(xp, w_gat, (stride, stride), "VALID",
                                   rhs_dilation=(dilation, dilation),
                                   dimension_numbers=dn)
    sig = sig + params["b_conv"].reshape(1, -1, 1, 1)
    gat = gat + params["b_gate"].reshape(1, -1, 1, 1)
    return sig * jax.nn.sigmoid(gat) * 1.8


# ----------------------------- main ------------------------------------------
if __name__ == "__main__":
    in_ch, out_ch, ks, stride, dilation = 4, 8, 3, 1, 1
    B, H, W = 2, 16, 16

    key = jax.random.PRNGKey(0)
    kx, kw1, kb1, kw2, kb2 = jax.random.split(key, 5)

    x = jax.random.normal(kx, (B, in_ch, H, W), dtype=jnp.float32)

    fan_in = in_ch * ks * ks
    bound = 1.0 / np.sqrt(fan_in)
    params = {
        "w_conv": jax.random.uniform(kw1, (out_ch, in_ch, ks, ks),
                                     minval=-bound, maxval=bound, dtype=jnp.float32),
        "b_conv": jax.random.uniform(kb1, (out_ch,),
                                     minval=-bound, maxval=bound, dtype=jnp.float32),
        "gain_conv": jnp.ones((out_ch, 1, 1, 1), jnp.float32),
        "w_gate": jax.random.uniform(kw2, (out_ch, in_ch, ks, ks),
                                     minval=-bound, maxval=bound, dtype=jnp.float32),
        "b_gate": jax.random.uniform(kb2, (out_ch,),
                                     minval=-bound, maxval=bound, dtype=jnp.float32),
        "gain_gate": jnp.ones((out_ch, 1, 1, 1), jnp.float32),
    }

    ref = jax.block_until_ready(
        reference_forward(x, params, ks=ks, stride=stride, dilation=dilation))

    # Exact path (f32 MXU operands): tight tolerance vs f32 reference.
    out_f32 = jax.block_until_ready(
        gated_ws_conv_padded(x, params, ks=ks, stride=stride, dilation=dilation,
                             compute_dtype=jnp.float32))
    np.testing.assert_allclose(np.asarray(out_f32), np.asarray(ref),
                               rtol=1e-4, atol=1e-4)

    # Fast path (bf16 MXU operands, f32 accumulation/gating): bf16-level tolerance.
    out_bf16 = jax.block_until_ready(
        gated_ws_conv_padded(x, params, ks=ks, stride=stride, dilation=dilation,
                             compute_dtype=jnp.bfloat16))
    np.testing.assert_allclose(np.asarray(out_bf16), np.asarray(ref),
                               rtol=5e-2, atol=5e-2)

    print("KERNEL_OK")
</pallas_src>

<mosaic_0001>
module attributes {stable_mosaic.version = 11 : i64} {
  func.func @kernel(%arg0: i32, %arg1: memref<1x8x422xf32, #tpu.memory_space<vmem>>, %arg2: memref<9x16x8xf32, #tpu.memory_space<vmem>>, %arg3: memref<16x1xf32, #tpu.memory_space<vmem>>, %arg4: memref<1x8x384xf32, #tpu.memory_space<vmem>>) attributes {dimension_semantics = [#tpu.dimension_semantics<parallel>], iteration_bounds = array<i64: 2>, scalar_prefetch = 0 : i64, scratch_operands = 0 : i64, tpu.core_type = #tpu.core_type<tc>, window_params = [{transform_indices = @transform_0, window_bounds = array<i64: 1, 8, 422>}, {pipeline_mode = #tpu.pipeline_mode<synchronous>, transform_indices = @transform_1, window_bounds = array<i64: 9, 16, 8>}, {pipeline_mode = #tpu.pipeline_mode<synchronous>, transform_indices = @transform_2, window_bounds = array<i64: 16, 1>}, {transform_indices = @transform_3, window_bounds = array<i64: 1, 8, 384>}]} {
    %cst = arith.constant 0.000000e+00 : f32
    %0 = vector.broadcast %cst : f32 to vector<16x384xf32>
    %c0 = arith.constant 0 : index
    %c0_0 = arith.constant 0 : index
    %c0_1 = arith.constant 0 : index
    %1 = vector.load %arg2[%c0, %c0_0, %c0_1] : memref<9x16x8xf32, #tpu.memory_space<vmem>>, vector<1x16x8xf32>
    %2 = vector.shape_cast %1 : vector<1x16x8xf32> to vector<16x8xf32>
    %c0_2 = arith.constant 0 : index
    %c0_3 = arith.constant 0 : index
    %c0_4 = arith.constant 0 : index
    %3 = vector.load %arg1[%c0_2, %c0_3, %c0_4] : memref<1x8x422xf32, #tpu.memory_space<vmem>>, vector<1x8x384xf32>
    %4 = vector.shape_cast %3 : vector<1x8x384xf32> to vector<8x384xf32>
    %cst_5 = arith.constant dense<0.000000e+00> : vector<16x384xf32>
    %5 = tpu.matmul %2, %4, %cst_5 {dimension_numbers = #tpu.dot_dimension_numbers<[1], [0], [0], [1], [0, 0, 1, 1], [], []>} : vector<16x8xf32>, vector<8x384xf32>, vector<16x384xf32> -> vector<16x384xf32>
    %6 = arith.addf %0, %5 : vector<16x384xf32>
    %c1 = arith.constant 1 : index
    %c0_6 = arith.constant 0 : index
    %c0_7 = arith.constant 0 : index
    %7 = vector.load %arg2[%c1, %c0_6, %c0_7] : memref<9x16x8xf32, #tpu.memory_space<vmem>>, vector<1x16x8xf32>
    %8 = vector.shape_cast %7 : vector<1x16x8xf32> to vector<16x8xf32>
    %c0_8 = arith.constant 0 : index
    %c0_9 = arith.constant 0 : index
    %c1_10 = arith.constant 1 : index
    %9 = vector.load %arg1[%c0_8, %c0_9, %c1_10] : memref<1x8x422xf32, #tpu.memory_space<vmem>>, vector<1x8x384xf32>
    %10 = vector.shape_cast %9 : vector<1x8x384xf32> to vector<8x384xf32>
    %cst_11 = arith.constant dense<0.000000e+00> : vector<16x384xf32>
    %11 = tpu.matmul %8, %10, %cst_11 {dimension_numbers = #tpu.dot_dimension_numbers<[1], [0], [0], [1], [0, 0, 1, 1], [], []>} : vector<16x8xf32>, vector<8x384xf32>, vector<16x384xf32> -> vector<16x384xf32>
    %12 = arith.addf %6, %11 : vector<16x384xf32>
    %c2 = arith.constant 2 : index
    %c0_12 = arith.constant 0 : index
    %c0_13 = arith.constant 0 : index
    %13 = vector.load %arg2[%c2, %c0_12, %c0_13] : memref<9x16x8xf32, #tpu.memory_space<vmem>>, vector<1x16x8xf32>
    %14 = vector.shape_cast %13 : vector<1x16x8xf32> to vector<16x8xf32>
    %c0_14 = arith.constant 0 : index
    %c0_15 = arith.constant 0 : index
    %c2_16 = arith.constant 2 : index
    %15 = vector.load %arg1[%c0_14, %c0_15, %c2_16] : memref<1x8x422xf32, #tpu.memory_space<vmem>>, vector<1x8x384xf32>
    %16 = vector.shape_cast %15 : vector<1x8x384xf32> to vector<8x384xf32>
    %cst_17 = arith.constant dense<0.000000e+00> : vector<16x384xf32>
    %17 = tpu.matmul %14, %16, %cst_17 {dimension_numbers = #tpu.dot_dimension_numbers<[1], [0], [0], [1], [0, 0, 1, 1], [], []>} : vector<16x8xf32>, vector<8x384xf32>, vector<16x384xf32> -> vector<16x384xf32>
    %18 = arith.addf %12, %17 : vector<16x384xf32>
    %c3 = arith.constant 3 : index
    %c0_18 = arith.constant 0 : index
    %c0_19 = arith.constant 0 : index
    %19 = vector.load %arg2[%c3, %c0_18, %c0_19] : memref<9x16x8xf32, #tpu.memory_space<vmem>>, vector<1x16x8xf32>
    %20 = vector.shape_cast %19 : vector<1x16x8xf32> to vector<16x8xf32>
    %c0_20 = arith.constant 0 : index
    %c0_21 = arith.constant 0 : index
    %c18 = arith.constant 18 : index
    %21 = vector.load %arg1[%c0_20, %c0_21, %c18] : memref<1x8x422xf32, #tpu.memory_space<vmem>>, vector<1x8x384xf32>
    %22 = vector.shape_cast %21 : vector<1x8x384xf32> to vector<8x384xf32>
    %cst_22 = arith.constant dense<0.000000e+00> : vector<16x384xf32>
    %23 = tpu.matmul %20, %22, %cst_22 {dimension_numbers = #tpu.dot_dimension_numbers<[1], [0], [0], [1], [0, 0, 1, 1], [], []>} : vector<16x8xf32>, vector<8x384xf32>, vector<16x384xf32> -> vector<16x384xf32>
    %24 = arith.addf %18, %23 : vector<16x384xf32>
    %c4 = arith.constant 4 : index
    %c0_23 = arith.constant 0 : index
    %c0_24 = arith.constant 0 : index
    %25 = vector.load %arg2[%c4, %c0_23, %c0_24] : memref<9x16x8xf32, #tpu.memory_space<vmem>>, vector<1x16x8xf32>
    %26 = vector.shape_cast %25 : vector<1x16x8xf32> to vector<16x8xf32>
    %c0_25 = arith.constant 0 : index
    %c0_26 = arith.constant 0 : index
    %c19 = arith.constant 19 : index
    %27 = vector.load %arg1[%c0_25, %c0_26, %c19] : memref<1x8x422xf32, #tpu.memory_space<vmem>>, vector<1x8x384xf32>
    %28 = vector.shape_cast %27 : vector<1x8x384xf32> to vector<8x384xf32>
    %cst_27 = arith.constant dense<0.000000e+00> : vector<16x384xf32>
    %29 = tpu.matmul %26, %28, %cst_27 {dimension_numbers = #tpu.dot_dimension_numbers<[1], [0], [0], [1], [0, 0, 1, 1], [], []>} : vector<16x8xf32>, vector<8x384xf32>, vector<16x384xf32> -> vector<16x384xf32>
    %30 = arith.addf %24, %29 : vector<16x384xf32>
    %c5 = arith.constant 5 : index
    %c0_28 = arith.constant 0 : index
    %c0_29 = arith.constant 0 : index
    %31 = vector.load %arg2[%c5, %c0_28, %c0_29] : memref<9x16x8xf32, #tpu.memory_space<vmem>>, vector<1x16x8xf32>
    %32 = vector.shape_cast %31 : vector<1x16x8xf32> to vector<16x8xf32>
    %c0_30 = arith.constant 0 : index
    %c0_31 = arith.constant 0 : index
    %c20 = arith.constant 20 : index
    %33 = vector.load %arg1[%c0_30, %c0_31, %c20] : memref<1x8x422xf32, #tpu.memory_space<vmem>>, vector<1x8x384xf32>
    %34 = vector.shape_cast %33 : vector<1x8x384xf32> to vector<8x384xf32>
    %cst_32 = arith.constant dense<0.000000e+00> : vector<16x384xf32>
    %35 = tpu.matmul %32, %34, %cst_32 {dimension_numbers = #tpu.dot_dimension_numbers<[1], [0], [0], [1], [0, 0, 1, 1], [], []>} : vector<16x8xf32>, vector<8x384xf32>, vector<16x384xf32> -> vector<16x384xf32>
    %36 = arith.addf %30, %35 : vector<16x384xf32>
    %c6 = arith.constant 6 : index
    %c0_33 = arith.constant 0 : index
    %c0_34 = arith.constant 0 : index
    %37 = vector.load %arg2[%c6, %c0_33, %c0_34] : memref<9x16x8xf32, #tpu.memory_space<vmem>>, vector<1x16x8xf32>
    %38 = vector.shape_cast %37 : vector<1x16x8xf32> to vector<16x8xf32>
    %c0_35 = arith.constant 0 : index
    %c0_36 = arith.constant 0 : index
    %c36 = arith.constant 36 : index
    %39 = vector.load %arg1[%c0_35, %c0_36, %c36] : memref<1x8x422xf32, #tpu.memory_space<vmem>>, vector<1x8x384xf32>
    %40 = vector.shape_cast %39 : vector<1x8x384xf32> to vector<8x384xf32>
    %cst_37 = arith.constant dense<0.000000e+00> : vector<16x384xf32>
    %41 = tpu.matmul %38, %40, %cst_37 {dimension_numbers = #tpu.dot_dimension_numbers<[1], [0], [0], [1], [0, 0, 1, 1], [], []>} : vector<16x8xf32>, vector<8x384xf32>, vector<16x384xf32> -> vector<16x384xf32>
    %42 = arith.addf %36, %41 : vector<16x384xf32>
    %c7 = arith.constant 7 : index
    %c0_38 = arith.constant 0 : index
    %c0_39 = arith.constant 0 : index
    %43 = vector.load %arg2[%c7, %c0_38, %c0_39] : memref<9x16x8xf32, #tpu.memory_space<vmem>>, vector<1x16x8xf32>
    %44 = vector.shape_cast %43 : vector<1x16x8xf32> to vector<16x8xf32>
    %c0_40 = arith.constant 0 : index
    %c0_41 = arith.constant 0 : index
    %c37 = arith.constant 37 : index
    %45 = vector.load %arg1[%c0_40, %c0_41, %c37] : memref<1x8x422xf32, #tpu.memory_space<vmem>>, vector<1x8x384xf32>
    %46 = vector.shape_cast %45 : vector<1x8x384xf32> to vector<8x384xf32>
    %cst_42 = arith.constant dense<0.000000e+00> : vector<16x384xf32>
    %47 = tpu.matmul %44, %46, %cst_42 {dimension_numbers = #tpu.dot_dimension_numbers<[1], [0], [0], [1], [0, 0, 1, 1], [], []>} : vector<16x8xf32>, vector<8x384xf32>, vector<16x384xf32> -> vector<16x384xf32>
    %48 = arith.addf %42, %47 : vector<16x384xf32>
    %c8 = arith.constant 8 : index
    %c0_43 = arith.constant 0 : index
    %c0_44 = arith.constant 0 : index
    %49 = vector.load %arg2[%c8, %c0_43, %c0_44] : memref<9x16x8xf32, #tpu.memory_space<vmem>>, vector<1x16x8xf32>
    %50 = vector.shape_cast %49 : vector<1x16x8xf32> to vector<16x8xf32>
    %c0_45 = arith.constant 0 : index
    %c0_46 = arith.constant 0 : index
    %c38 = arith.constant 38 : index
    %51 = vector.load %arg1[%c0_45, %c0_46, %c38] : memref<1x8x422xf32, #tpu.memory_space<vmem>>, vector<1x8x384xf32>
    %52 = vector.shape_cast %51 : vector<1x8x384xf32> to vector<8x384xf32>
    %cst_47 = arith.constant dense<0.000000e+00> : vector<16x384xf32>
    %53 = tpu.matmul %50, %52, %cst_47 {dimension_numbers = #tpu.dot_dimension_numbers<[1], [0], [0], [1], [0, 0, 1, 1], [], []>} : vector<16x8xf32>, vector<8x384xf32>, vector<16x384xf32> -> vector<16x384xf32>
    %54 = arith.addf %48, %53 : vector<16x384xf32>
    %c0_48 = arith.constant 0 : index
    %c0_49 = arith.constant 0 : index
    %55 = vector.load %arg3[%c0_48, %c0_49] : memref<16x1xf32, #tpu.memory_space<vmem>>, vector<16x1xf32>
    %56 = vector.extract_strided_slice %54 {offsets = [0, 0], sizes = [8, 384], strides = [1, 1]} : vector<16x384xf32> to vector<8x384xf32>
    %57 = vector.extract_strided_slice %55 {offsets = [0, 0], sizes = [8, 1], strides = [1, 1]} : vector<16x1xf32> to vector<8x1xf32>
    %58 = vector.broadcast %57 : vector<8x1xf32> to vector<8x384xf32>
    %59 = arith.addf %56, %58 : vector<8x384xf32>
    %60 = vector.extract_strided_slice %54 {offsets = [8, 0], sizes = [8, 384], strides = [1, 1]} : vector<16x384xf32> to vector<8x384xf32>
    %61 = vector.extract_strided_slice %55 {offsets = [8, 0], sizes = [8, 1], strides = [1, 1]} : vector<16x1xf32> to vector<8x1xf32>
    %62 = vector.broadcast %61 : vector<8x1xf32> to vector<8x384xf32>
    %63 = arith.addf %60, %62 : vector<8x384xf32>
    %64 = arith.negf %63 : vector<8x384xf32>
    %65 = math.exp %64 : vector<8x384xf32>
    %cst_50 = arith.constant 1.000000e+00 : f32
    %66 = vector.broadcast %cst_50 : f32 to vector<8x384xf32>
    %67 = arith.addf %66, %65 : vector<8x384xf32>
    %68 = arith.divf %66, %67 : vector<8x384xf32>
    %69 = arith.mulf %59, %68 : vector<8x384xf32>
    %c0_51 = arith.constant 0 : index
    %c0_52 = arith.constant 0 : index
    %c0_53 = arith.constant 0 : index
    %70 = vector.load %arg4[%c0_51, %c0_52, %c0_53] : memref<1x8x384xf32, #tpu.memory_space<vmem>>, vector<1x8x384xf32>
    %71 = vector.shape_cast %70 : vector<1x8x384xf32> to vector<8x384xf32>
    %72 = vector.shape_cast %69 : vector<8x384xf32> to vector<1x8x384xf32>
    tpu.vector_store %arg4[%c0_51, %c0_52, %c0_53], %72 {strides = array<i32>} : memref<1x8x384xf32, #tpu.memory_space<vmem>>, vector<1x8x384xf32>,
    return
  }
  func.func @transform_0(%arg0: i32) -> (i32, i32, i32) {
    %c0_i32 = arith.constant 0 : i32
    %c0_i32_0 = arith.constant 0 : i32
    %c0_i32_1 = arith.constant 0 : i32
    return %arg0, %c0_i32, %c0_i32_0 : i32, i32, i32
  }
  func.func @transform_1(%arg0: i32) -> (i32, i32, i32) {
    %c0_i32 = arith.constant 0 : i32
    %c0_i32_0 = arith.constant 0 : i32
    %c0_i32_1 = arith.constant 0 : i32
    %c0_i32_2 = arith.constant 0 : i32
    return %c0_i32, %c0_i32_0, %c0_i32_1 : i32, i32, i32
  }
  func.func @transform_2(%arg0: i32) -> (i32, i32) {
    %c0_i32 = arith.constant 0 : i32
    %c0_i32_0 = arith.constant 0 : i32
    %c0_i32_1 = arith.constant 0 : i32
    return %c0_i32, %c0_i32_0 : i32, i32
  }
  func.func @transform_3(%arg0: i32) -> (i32, i32, i32) {
    %c0_i32 = arith.constant 0 : i32
    %c0_i32_0 = arith.constant 0 : i32
    %c0_i32_1 = arith.constant 0 : i32
    return %arg0, %c0_i32, %c0_i32_0 : i32, i32, i32
  }
}

</mosaic_0001>

<bundles_post_ra>
// kernel: tpu_custom_call.1
= control target key start
LH: loop header
LB: loop body
LE: loop exit
PB: predicated region body
PF: predicated region fallthrough
CT: control target
= control target key end

     0   :  { %8 = vsyncpa [#allocation3], 0  ;;  %s1786_s0 = inlined_call_operand.vmem [shape: f32[2,8,422], index: 0, kind: input, shape index: {}]   ;;  %s1787_s1 = inlined_call_operand.vmem [shape: f32[9,16,8], index: 1, kind: input, shape index: {}]   ;;  %s1788_s2 = inlined_call_operand.vmem [shape: f32[16,1], index: 2, kind: input, shape index: {}]   ;;  %s1789_s3 = inlined_call_operand.hbm [shape: f32[2,8,384], index: 3, kind: output, shape index: {}]  }
   0x1   :  { %10 = vsyncpa [#allocation3 + $0x1], 0  ;;  %s1505_s12 = smov 0   ;;  %s1507_s13 = smov 0  }
   0x2   :  { %s1509_s14 = smov 0   ;;  %s1511_s15 = smov 0  }
   0x3 LB: > { %s1526_s16 = sadd.s32 4294967295, %s1474_s15   ;;  %s1198_s17 = sadd.s32 4294967294, %s1474_s15   ;;  %s1474_s15 = sphi %s1511_s15, %s1795_s15   ;;  %s1470_s14 = sphi %s1509_s14, %s1794_s14   ;;  %s1466_s13 = sphi %s1507_s13, %s1793_s13   ;;  %s1462_s12 = sphi %s1505_s12, %s1792_s12  }
   0x4   : > { %s1530_s18 = sadd.s32 1, %s1474_s15   ;;  %s91_s19 = sadd.s32 1, %s1470_s14 }
   0x5   : > { %s88_s20 = ssub.s32 %s1474_s15, %s1530_s18  ;;  %p101_p0 = scmp.ne.s32.totalorder %s1470_s14, %s1466_s13 }
   0x6   : > { %p89_p1 = scmp.eq.s32.totalorder %s88_s20, 0  ;;  %p102_p2 = scmp.eq.s32.totalorder %s1526_s16, 1 }
   0x7   : > { %p107_p3 = scmp.ne.s32.totalorder %s1466_s13, %s1462_s12  ;;  %p108_p4 = scmp.eq.s32.totalorder %s1198_s17, 1 }
   0x8   : > { %s1541_s21 = scalar_select %p89_p1, %s1470_s14, %s91_s19  }
   0x9   : > { %p1543_p5 = por %p102_p2, %p101_p0  ;;  %p1547_p6 = por %p108_p4, %p107_p3 }
   0xa   : > { %p1201_p7 = scmp.ge.s32.totalorder %s1474_s15, 1  ;;  %p140_p8 = scmp.lt.s32.totalorder %s1474_s15, 3 }
   0xc   : > { %p141_p9 = pnand %p1201_p7, %p140_p8 }
   0xd   : > { %p164_p10 = scmp.lt.s32.totalorder (!%p141_p9), %s1526_s16, 1  ;;  %s1476_s29 = smov (!%p141_p9), 127  }
   0xe   : > { %144 = sbr.rel (%p141_p9) target bundleno = 423 (0x1a7), region = 32  ;;  %s1477_s30 = smov (!%p141_p9), 126  }
   0xf   : > { %s1478_s4 = smov (!%p141_p9), 110   ;;  %s1479_s5 = smov (!%p141_p9), 109  }
  0x10   : > { %s1480_s6 = smov (!%p141_p9), 108   ;;  %s1481_s7 = smov (!%p141_p9), 92  }
  0x11   : > { %s1482_s8 = smov (!%p141_p9), 91   ;;  %s1483_s9 = smov (!%p141_p9), 90  }
  0x12   : > { %s161_s20 = sand.u32 (!%p141_p9), 1, %s1466_s13  }
  0x13   : > { %s165_s24 = scalar_select %p164_p10, %s1526_s16, 1  ;;  %vm190_vm0 = vcmask 1039360   ;;  %vm359_vm1 = vcmask 1031168   ;;  %vm458_vm2 = vcmask 900096   ;;  %v1204_v17 = vld [vmem:[%s1787_s1 + $0x10] sm:$0xff]  ;;  %vm197_vm3 = vcmask 64512  }
  0x14   : > { %v1205_v28 = vld [vmem:[%s1787_s1 + $0x18] sm:$0xff]  ;;  %vm557_vm4 = vcmask 891904   ;;  %v169_v38 = vld [vmem:[%s1787_s1] sm:$0xff]  ;;  %v170_v46 = vld [vmem:[%s1787_s1 + $0x8] sm:$0xff]  ;;  %vm656_vm5 = vcmask 883712   ;;  %vm755_vm6 = vcmask 752640  }
  0x15   : > { %s1280_s25 = sshll.u32 %s165_s24, 5  ;;  %v1218_v44 = vld [vmem:[%s1787_s1 + $0x20] sm:$0xff]  ;;  %v1219_v48 = vld [vmem:[%s1787_s1 + $0x28] sm:$0xff]  ;;  %v1226_v59 = vld [vmem:[%s1787_s1 + $0x30] sm:$0xff]  ;;  %vm854_vm7 = vcmask 744448   ;;  %vm953_vm8 = vcmask 736256  }
  0x16   : > { %s168_s28 = scalar_lea.vmem %s1786_s0, %s1280_s25  ;;  %v1227_v63 = vld [vmem:[%s1787_s1 + $0x38] sm:$0xff]  ;;  %s1282_s24 = smul.u32 24, %s161_s20 }
  0x17   : > { %v1558_v0 = vld [vmem:[%s168_s28 + $0x10] sm:$0xff]  ;;  %v177_v1 = vld [vmem:[%s168_s28 + $0x18] sm:$0xff]  ;;  %v1561_v3 = vld [vmem:[%s168_s28] sm:$0xff]  ;;  %s1283_s25 = smul.u32 24, %s1526_s16 }
  0x18   : > { %v1332_v2 = vpack.i.bf16 %v177_v1, %v1558_v0  ;;  %v1563_v4 = vld [vmem:[%s168_s28 + $0x8] sm:$0xff]  ;;  %v1352_v7 = vpack.i.bf16 %v177_v1, %v1561_v3  ;;  %s1746_s26 = scalar_lea.vmem [#allocation2], %s1282_s24 }
  0x19   : > { %v1342_v5 = vpack.i.bf16 %v1563_v4, %v1561_v3  ;;  %v1347_v6 = vpack.i.bf16 %v1558_v0, %v1563_v4  ;;  %s1134_s28 = scalar_lea.hbm %s1789_s3, %s1283_s25 }
  0x1a   : > { %1333 = vrot.lane.b32.xlu0 %v1332_v2, %s1476_s29 }
  0x1b   : > { %1343 = vrot.lane.b32.xlu1 %v1342_v5, %s1477_s30  ;;  %1348 = vrot.lane.b32.xlu2 %v1347_v6, %s1478_s4 }
  0x22   : > { %1338 = vrot.lane.b32.xlu0 %v1342_v5, %s1476_s29  ;;  %s1136_s29 = sshll.u32 %s1746_s26, 4  ;;  %s1137_s29 = int_to_ptr.vmem [resolvable:$true] %s1136_s29 }
  0x23   : > { %355 = vrot.lane.b32.xlu1 %v1558_v0, %s1477_s30  ;;  %357 = vrot.lane.b32.xlu2 %v177_v1, %s1477_s30  ;;  %s1138_s30 = sshll.u32 %s1134_s28, 4  ;;  %s1139_s30 = int_to_ptr.hbm [resolvable:$true] %s1138_s30 }
  0x2a   : > { %1353 = vrot.lane.b32.xlu0 %v1352_v7, %s1478_s4  ;;  %s1123_s4 = scalar_lea.sflag [#allocation3], %s161_s20 }
  0x2b   : > { %1358 = vrot.lane.b32.xlu1 %v1332_v2, %s1479_s5  ;;  %1363 = vrot.lane.b32.xlu2 %v1342_v5, %s1479_s5  ;;  %s1426_s5 = sshra.s32 %s1139_s30, 4  ;;  %s1427_s5 = int_to_ptr.hbm [resolvable:$true] %s1426_s5 }
  0x2c   : > { %p1433_p0 = scmp.lt.s32.totalorder %s1427_s5, %s1789_s3 }
  0x32   : > { %1368 = vrot.lane.b32.xlu0 %v1342_v5, %s1480_s6 }
  0x33   : > { %1373 = vrot.lane.b32.xlu1 %v1342_v5, %s1481_s7  ;;  %1378 = vrot.lane.b32.xlu2 %v1332_v2, %s1480_s6  ;;  %s1428_s6 = scalar_lea.hbm %s1427_s5, 24 }
  0x34   : > { %p1429_p11 = scmp.ne.s32.totalorder %s1427_s5, %s1428_s6 }
  0x36   : > { %p1430_p12 = pnand %p1429_p11, %p1543_p5 }
  0x38   : > { %p1431_p13 = pneg %p1430_p12 }
  0x3a   : > { %751 = vrot.lane.b32.xlu0 %v1558_v0, %s1481_s7 }
  0x3b   : > { %1383 = vrot.lane.b32.xlu1 %v1347_v6, %s1482_s8  ;;  %753 = vrot.lane.b32.xlu2 %v177_v1, %s1481_s7 }
  0x42   : > { %846 = vrot.lane.b32.xlu0 %v1561_v3, %s1482_s8 }
  0x43   : > { %852 = vrot.lane.b32.xlu1 %v177_v1, %s1482_s8  ;;  %1388 = vrot.lane.b32.xlu2 %v1332_v2, %s1483_s9 }
  0x4a   : > { %1393 = vrot.lane.b32.xlu0 %v1342_v5, %s1483_s9  ;;  %s1432_s9 = scalar_lea.hbm %s1789_s3, 48 }
  0x4b   : > { %p1434_p1 = scmp.lt.s32.totalorder %s1432_s9, %s1428_s6 }
  0x4d   : > { %p1435_p2 = por %p1434_p1, %p1433_p0 }
  0x4f   : > { %p1436_p3 = pnand %p1435_p2, %p1431_p13 }
  0x75   : > { %v1349_v8 = vpop.permute.xlu2 %1348 }
  0x76   : > { %v1351_v10 = vunpack.i.h.bf16 %v1349_v8  ;;  %v1350_v11 = vunpack.i.l.bf16 %v1349_v8 }
  0x78   : > { %v460_v20 = vsel %vm458_vm2, %v1350_v11, %v1351_v10 }
  0x7d   : > { %v358_v21 = vpop.permute.xlu2 %357 }
  0x85   : > { %v1364_v30 = vpop.permute.xlu2 %1363 }
  0x86   : > { %v1366_v33 = vunpack.i.h.bf16 %v1364_v30  ;;  %v1365_v34 = vunpack.i.l.bf16 %v1364_v30  ;;  %v1259_v30 = vld [vmem:[%s1787_s1 + $0x78] sm:$0xff] }
  0x88   : > { %v558_v43 = vsel %vm557_vm4, %v1365_v34, %v1366_v33 }
  0x8c   : > { %v1334_v9 = vpop.permute.xlu0 %1333 }
  0x8d   : > { %v1336_v12 = vunpack.i.h.bf16 %v1334_v9  ;;  %v1335_v13 = vunpack.i.l.bf16 %v1334_v9  ;;  %v1344_v14 = vpop.permute.xlu1 %1343  ;;  %v1379_v49 = vpop.permute.xlu2 %1378 }
  0x8e   : > { %v1346_v15 = vunpack.i.h.bf16 %v1344_v14  ;;  %v1345_v16 = vunpack.i.l.bf16 %v1344_v14  ;;  %v1380_v54 = vunpack.i.l.bf16 %v1379_v49  ;;  %v1381_v61 = vunpack.i.h.bf16 %v1379_v49 }
  0x8f   : > { %v193_v18 = vsel %vm190_vm0, %v1335_v13, %v1336_v12 }
  0x90   : > { %265 = vmatpush.msra.mxu2 %v193_v18  ;;  %v360_v19 = vsel %vm359_vm1, %v1345_v16, %v1346_v15  ;;  %v659_v62 = vsel %vm656_vm5, %v1380_v54, %v1381_v61 }
  0x91   : > { %1210 = vmatmul.msk.f32.vlgmr.msra.gmra.mxu2 %vm197_vm3, %v1204_v17 }
  0x92   : > { %387 = vmatpush.msrb.mxu2 %v360_v19 }
  0x94   : > { %509 = vmatpush.msra.mxu2 %v460_v20  ;;  %v1339_v22 = vpop.permute.xlu0 %1338 }
  0x95   : > { %v356_v23 = vpop.permute.xlu1 %355  ;;  %v1341_v24 = vunpack.i.h.bf16 %v1339_v22  ;;  %v1340_v25 = vunpack.i.l.bf16 %v1339_v22  ;;  %v754_v2 = vpop.permute.xlu2 %753  ;;  %v1250_v22 = vld [vmem:[%s1787_s1 + $0x60] sm:$0xff] }
  0x96   : > { %v361_v29 = vsel %vm359_vm1, %v1346_v15, %v356_v23  ;;  %v362_v31 = vsel %vm359_vm1, %v356_v23, %v358_v21 }
  0x97   : > { %v191_v26 = vsel %vm190_vm0, %v1340_v25, %v1341_v24  ;;  %v192_v27 = vsel %vm190_vm0, %v1341_v24, %v1335_v13  ;;  %v1243_v24 = vld [vmem:[%s1787_s1 + $0x58] sm:$0xff] }
  0x98   : > { %219 = vmatpush.msra.mxu0 %v191_v26  ;;  %1281 = vmatpush.msra.mxu3 %v191_v26  ;;  %v1251_v26 = vld [vmem:[%s1787_s1 + $0x68] sm:$0xff] }
  0x99   : > { %242 = vmatpush.msra.mxu1 %v192_v27  ;;  %1206 = vmatmul.msk.f32.vlgmr.msra.gmra.mxu0 %vm197_vm3, %v1204_v17  ;;  %v1258_v27 = vld [vmem:[%s1787_s1 + $0x70] sm:$0xff] }
  0x9a   : > { %1207 = vmatmul.msk.f32.vlgmr.msra.gmra.mxu3 %vm197_vm3, %v1205_v28  ;;  %1208 = vmatmul.msk.f32.vlgmr.msra.gmra.mxu1 %vm197_vm3, %v1204_v17  ;;  %v1242_v17 = vld [vmem:[%s1787_s1 + $0x50] sm:$0xff] }
  0x9b   : > { %294 = vmatpush.msrb.mxu3 %v1561_v3  ;;  %340 = vmatpush.msrb.mxu1 %v1558_v0  ;;  %v1234_v3 = vld [vmem:[%s1787_s1 + $0x40] sm:$0xff] }
  0x9c   : > { %1211 = vmatmul.msk.f32.gmra.mxu2 %vm197_vm3, %v1205_v28  ;;  %v1354_v32 = vpop.permute.xlu0 %1353  ;;  %317 = vmatpush.msrb.mxu0 %v1563_v4 }
  0x9d   : > { %410 = vmatpush.msra.mxu3 %v361_v29  ;;  %v1356_v35 = vunpack.i.h.bf16 %v1354_v32  ;;  %v1355_v36 = vunpack.i.l.bf16 %v1354_v32  ;;  %v1359_v37 = vpop.permute.xlu1 %1358  ;;  %v1389_v13 = vpop.permute.xlu2 %1388  ;;  %v1484_v29 = vmov 0   ;;  %v1041_v32 = vld [vmem:[%s1788_s2] sm:$0xff] }
  0x9e   : > { %433 = vmatpush.msra.mxu0 %v362_v31  ;;  %v1361_v39 = vunpack.i.h.bf16 %v1359_v37  ;;  %v1360_v40 = vunpack.i.l.bf16 %v1359_v37  ;;  %v1391_v18 = vunpack.i.h.bf16 %v1389_v13  ;;  %v1390_v19 = vunpack.i.l.bf16 %v1389_v13  ;;  %1397 = vset.pattern.permute.xlu1 %v1484_v29  ;;  %v1266_v31 = vld [vmem:[%s1787_s1 + $0x80] sm:$0xff] }
  0x9f   : > { %v459_v41 = vsel %vm458_vm2, %v1355_v36, %v1350_v11  ;;  %v461_v42 = vsel %vm458_vm2, %v1351_v10, %v1356_v35  ;;  %v1235_v10 = vld [vmem:[%s1787_s1 + $0x48] sm:$0xff]  ;;  %1398 = vset.pattern.permute.xlu2 %v1484_v29  ;;  %1399 = vset.pattern.permute.xlu0 %v1484_v29 }
  0xa0   : > { %486 = vmatpush.msra.mxu1 %v459_v41  ;;  %v560_v45 = vsel %vm557_vm4, %v1360_v40, %v1361_v39  ;;  %v559_v47 = vsel %vm557_vm4, %v1366_v33, %v1360_v40  ;;  %v956_v23 = vsel %vm953_vm8, %v1390_v19, %v1391_v18  ;;  %1045 = vperm.xlu2 %1398, %v1041_v32   ;;  %v1267_v33 = vld [vmem:[%s1787_s1 + $0x88] sm:$0xff] }
  0xa1   : > { %1214 = vmatmul.msk.f32.vlgmr.msrb.gmra.mxu0 %vm197_vm3, %v169_v38 }
  0xa2   : > { %1209 = vmatmul.msk.f32.gmra.mxu1 %vm197_vm3, %v1205_v28  ;;  %1212 = vmatmul.msk.f32.vlgmr.msrb.gmra.mxu3 %vm197_vm3, %v169_v38  ;;  %v1042_v28 = vld [vmem:[%s1788_s2 + $0x8] sm:$0xff] }
  0xa3   : > { %532 = vmatpush.msrb.mxu3 %v461_v42  ;;  %585 = vmatpush.msrb.mxu0 %v558_v43 }
  0xa4   : > { %1220 = vmatmul.msk.f32.vlgmr.msrb.gmra.mxu2 %vm197_vm3, %v1218_v44  ;;  %v1369_v50 = vpop.permute.xlu0 %1368  ;;  %1053 = vperm.xlu1 %1397, %v1042_v28  }
  0xa5   : > { %631 = vmatpush.msrb.mxu2 %v560_v45  ;;  %v1374_v51 = vpop.permute.xlu1 %1373  ;;  %v1371_v52 = vunpack.i.h.bf16 %v1369_v50  ;;  %v1370_v53 = vunpack.i.l.bf16 %v1369_v50 }
  0xa6   : > { %v1376_v55 = vunpack.i.h.bf16 %v1374_v51  ;;  %v1375_v56 = vunpack.i.l.bf16 %v1374_v51 }
  0xa7   : > { %v657_v57 = vsel %vm656_vm5, %v1370_v53, %v1371_v52  ;;  %v658_v58 = vsel %vm656_vm5, %v1371_v52, %v1380_v54 }
  0xa8   : > { %v756_v60 = vsel %vm755_vm6, %v1375_v56, %v1376_v55 }
  0xa9   : > { %1215 = vmatmul.msk.f32.gmra.mxu0 %vm197_vm3, %v170_v46 }
  0xaa   : > { %1213 = vmatmul.msk.f32.gmra.mxu3 %vm197_vm3, %v170_v46  ;;  %1216 = vmatmul.msk.f32.vlgmr.msrb.gmra.mxu1 %vm197_vm3, %v169_v38 }
  0xab   : > { %608 = vmatpush.msrb.mxu1 %v559_v47 }
  0xac   : > { %1221 = vmatmul.msk.f32.gmra.mxu2 %vm197_vm3, %v1219_v48  ;;  %v752_v0 = vpop.permute.xlu0 %751 }
  0xad   : > { %v1384_v1 = vpop.permute.xlu1 %1383  ;;  %v757_v6 = vsel %vm755_vm6, %v1376_v55, %v752_v0  ;;  %v758_v7 = vsel %vm755_vm6, %v752_v0, %v754_v2 }
  0xae   : > { %v1386_v4 = vunpack.i.h.bf16 %v1384_v1  ;;  %v1385_v5 = vunpack.i.l.bf16 %v1384_v1 }
  0xb0   : > { %v856_v9 = vsel %vm854_vm7, %v1385_v5, %v1386_v4 }
  0xb1   : > { %1224 = vmatmul.msk.f32.vlgmr.msra.gmra.mxu0 %vm197_vm3, %v1218_v44 }
  0xb2   : > { %1217 = vmatmul.msk.f32.gmra.mxu1 %vm197_vm3, %v170_v46  ;;  %1222 = vmatmul.msk.f32.vlgmr.msra.gmra.mxu3 %vm197_vm3, %v1218_v44 }
  0xb3   : > { %684 = vmatpush.msra.mxu3 %v657_v57  ;;  %707 = vmatpush.msra.mxu0 %v658_v58 }
  0xb4   : > { %1230 = vmatmul.msk.f32.vlgmr.msra.gmra.mxu2 %vm197_vm3, %v1226_v59  ;;  %v847_v8 = vpop.permute.xlu0 %846 }
  0xb5   : > { %783 = vmatpush.msra.mxu2 %v756_v60  ;;  %v855_v11 = vsel %vm854_vm7, %v847_v8, %v1385_v5  ;;  %v853_v16 = vpop.permute.xlu1 %852 }
  0xb6   : > { %v857_v20 = vsel %vm854_vm7, %v1386_v4, %v853_v16 }
  0xb9   : > { %1225 = vmatmul.msk.f32.gmra.mxu0 %vm197_vm3, %v1219_v48 }
  0xba   : > { %1223 = vmatmul.msk.f32.gmra.mxu3 %vm197_vm3, %v1219_v48  ;;  %1228 = vmatmul.msk.f32.vlgmr.msra.gmra.mxu1 %vm197_vm3, %v1226_v59 }
  0xbb   : > { %730 = vmatpush.msra.mxu1 %v659_v62 }
  0xbc   : > { %1231 = vmatmul.msk.f32.gmra.mxu2 %vm197_vm3, %v1227_v63  ;;  %v1394_v12 = vpop.permute.xlu0 %1393 }
  0xbd   : > { %v1396_v14 = vunpack.i.h.bf16 %v1394_v12  ;;  %v1395_v15 = vunpack.i.l.bf16 %v1394_v12 }
  0xbf   : > { %v954_v21 = vsel %vm953_vm8, %v1395_v15, %v1396_v14  ;;  %v955_v25 = vsel %vm953_vm8, %v1396_v14, %v1390_v19 }
  0xc1   : > { %1236 = vmatmul.msk.f32.vlgmr.msrb.gmra.mxu0 %vm197_vm3, %v1234_v3 }
  0xc2   : > { %1229 = vmatmul.msk.f32.gmra.mxu1 %vm197_vm3, %v1227_v63  ;;  %1232 = vmatmul.msk.f32.vlgmr.msrb.gmra.mxu3 %vm197_vm3, %v1226_v59 }
  0xc3   : > { %806 = vmatpush.msrb.mxu3 %v757_v6  ;;  %829 = vmatpush.msrb.mxu0 %v758_v7 }
  0xc4   : > { %1240 = vmatmul.msk.f32.vlgmr.msrb.gmra.mxu2 %vm197_vm3, %v1234_v3 }
  0xc5   : > { %905 = vmatpush.msrb.mxu2 %v856_v9 }
  0xc9   : > { %1237 = vmatmul.msk.f32.gmra.mxu0 %vm197_vm3, %v1235_v10 }
  0xca   : > { %1233 = vmatmul.msk.f32.gmra.mxu3 %vm197_vm3, %v1227_v63  ;;  %1238 = vmatmul.msk.f32.vlgmr.msrb.gmra.mxu1 %vm197_vm3, %v1234_v3 }
  0xcb   : > { %882 = vmatpush.msrb.mxu1 %v855_v11 }
  0xcc   : > { %1241 = vmatmul.msk.f32.gmra.mxu2 %vm197_vm3, %v1235_v10 }
  0xd1   : > { %1246 = vmatmul.msk.f32.vlgmr.msra.gmra.mxu0 %vm197_vm3, %v1242_v17 }
  0xd2   : > { %1239 = vmatmul.msk.f32.gmra.mxu1 %vm197_vm3, %v1235_v10  ;;  %1244 = vmatmul.msk.f32.vlgmr.msra.gmra.mxu3 %vm197_vm3, %v1242_v17 }
  0xd3   : > { %928 = vmatpush.msra.mxu3 %v857_v20  ;;  %981 = vmatpush.msra.mxu0 %v954_v21 }
  0xd4   : > { %1252 = vmatmul.msk.f32.vlgmr.msra.gmra.mxu2 %vm197_vm3, %v1250_v22 }
  0xd5   : > { %1027 = vmatpush.msra.mxu2 %v956_v23 }
  0xd9   : > { %1247 = vmatmul.msk.f32.gmra.mxu0 %vm197_vm3, %v1243_v24 }
  0xda   : > { %1245 = vmatmul.msk.f32.gmra.mxu3 %vm197_vm3, %v1243_v24  ;;  %1248 = vmatmul.msk.f32.vlgmr.msra.gmra.mxu1 %vm197_vm3, %v1242_v17 }
  0xdb   : > { %1004 = vmatpush.msra.mxu1 %v955_v25 }
  0xdc   : > { %1253 = vmatmul.msk.f32.gmra.mxu2 %vm197_vm3, %v1251_v26 }
  0xe1   : > { %1256 = vmatmul.msk.f32.vlgmr.msrb.gmra.mxu0 %vm197_vm3, %v1250_v22 }
  0xe2   : > { %1249 = vmatmul.msk.f32.gmra.mxu1 %vm197_vm3, %v1243_v24  ;;  %1254 = vmatmul.msk.f32.vlgmr.msrb.gmra.mxu3 %vm197_vm3, %v1250_v22 }
  0xe4   : > { %1262 = vmatmul.msk.f32.vlgmr.msrb.gmra.mxu2 %vm197_vm3, %v1258_v27 }
  0xe9   : > { %1257 = vmatmul.msk.f32.gmra.mxu0 %vm197_vm3, %v1251_v26 }
  0xea   : > { %1255 = vmatmul.msk.f32.gmra.mxu3 %vm197_vm3, %v1251_v26  ;;  %1260 = vmatmul.msk.f32.vlgmr.msrb.gmra.mxu1 %vm197_vm3, %v1258_v27 }
  0xec   : > { %1263 = vmatmul.msk.f32.gmra.mxu2 %vm197_vm3, %v1259_v30 }
  0xf1   : > { %1268 = vmatmul.msk.f32.vlgmr.msra.gmra.mxu0 %vm197_vm3, %v1266_v31 }
  0xf2   : > { %1261 = vmatmul.msk.f32.gmra.mxu1 %vm197_vm3, %v1259_v30  ;;  %1264 = vmatmul.msk.f32.vlgmr.msra.gmra.mxu3 %vm197_vm3, %v1258_v27 }
  0xf4   : > { %1272 = vmatmul.msk.f32.vlgmr.msra.gmra.mxu2 %vm197_vm3, %v1266_v31 }
  0xf9   : > { %1269 = vmatmul.msk.f32.gmra.mxu0 %vm197_vm3, %v1267_v33 }
  0xfa   : > { %1265 = vmatmul.msk.f32.gmra.mxu3 %vm197_vm3, %v1259_v30  ;;  %1270 = vmatmul.msk.f32.vlgmr.msra.gmra.mxu1 %vm197_vm3, %v1266_v31 }
  0xfc   : > { %1273 = vmatmul.msk.f32.gmra.mxu2 %vm197_vm3, %v1267_v33 }
 0x102   : > { %1271 = vmatmul.msk.f32.gmra.mxu1 %vm197_vm3, %v1267_v33 }
 0x114   : > { %v267_v34 = vpop.f32.mrf.mxu2 }
 0x116   : > { %v221_v35 = vpop.f32.mrf.mxu0 }
 0x117   : > { %v244_v36 = vpop.f32.mrf.mxu1 }
 0x11d   : > { %v224_v37 = vpop.f32.mrf.mxu3 }
 0x11e   : > { %v319_v38 = vpop.f32.mrf.mxu0 }
 0x11f   : > { %v247_v39 = vpop.f32.mrf.mxu1  ;;  %v270_v40 = vpop.f32.mrf.mxu2  ;;  %v320_v41 = vadd.f32 %v319_v38, %v244_v36 }
 0x125   : > { %v296_v42 = vpop.f32.mrf.mxu3 }
 0x126   : > { %v297_v43 = vadd.f32 %v296_v42, %v221_v35  ;;  %v322_v44 = vpop.f32.mrf.mxu0 }
 0x127   : > { %v323_v45 = vadd.f32 %v322_v44, %v247_v39  ;;  %v342_v46 = vpop.f32.mrf.mxu1  ;;  %v389_v47 = vpop.f32.mrf.mxu2 }
 0x128   : > { %v343_v48 = vadd.f32 %v342_v46, %v267_v34  ;;  %v441_v49 = vadd.f32 %v389_v47, %v297_v43  ;;  %v1054_v47 = vpop.permute.xlu1 %1053 }
 0x12d   : > { %v299_v50 = vpop.f32.mrf.mxu3 }
 0x12e   : > { %v435_v51 = vpop.f32.mrf.mxu0  ;;  %v300_v24 = vadd.f32 %v299_v50, %v224_v37 }
 0x12f   : > { %v345_v52 = vpop.f32.mrf.mxu1  ;;  %v392_v53 = vpop.f32.mrf.mxu2  ;;  %v443_v54 = vadd.f32 %v435_v51, %v343_v48 }
 0x130   : > { %v346_v55 = vadd.f32 %v345_v52, %v270_v40  ;;  %v444_v29 = vadd.f32 %v392_v53, %v300_v24 }
 0x135   : > { %v412_v56 = vpop.f32.mrf.mxu3 }
 0x136   : > { %v442_v57 = vadd.f32 %v412_v56, %v320_v41  ;;  %v438_v58 = vpop.f32.mrf.mxu0 }
 0x137   : > { %v488_v59 = vpop.f32.mrf.mxu1  ;;  %v511_v60 = vpop.f32.mrf.mxu2  ;;  %v446_v39 = vadd.f32 %v438_v58, %v346_v55 }
 0x138   : > { %v540_v61 = vadd.f32 %v488_v59, %v441_v49  ;;  %v541_v62 = vadd.f32 %v511_v60, %v442_v57 }
 0x13d   : > { %v415_v63 = vpop.f32.mrf.mxu3 }
 0x13e   : > { %v587_v0 = vpop.f32.mrf.mxu0  ;;  %v445_v38 = vadd.f32 %v415_v63, %v323_v45 }
 0x13f   : > { %v491_v1 = vpop.f32.mrf.mxu1  ;;  %v514_v2 = vpop.f32.mrf.mxu2  ;;  %v1714_v3 = vadd.f32 %v587_v0, %v540_v61 }
 0x140   : > { %v543_v30 = vadd.f32 %v491_v1, %v444_v29  ;;  %v544_v41 = vadd.f32 %v514_v2, %v445_v38 }
 0x145   : > { %v534_v4 = vpop.f32.mrf.mxu3 }
 0x146   : > { %v542_v5 = vadd.f32 %v534_v4, %v443_v54  ;;  %v590_v6 = vpop.f32.mrf.mxu0 }
 0x147   : > { %v610_v7 = vpop.f32.mrf.mxu1  ;;  %v633_v8 = vpop.f32.mrf.mxu2  ;;  %v642_v31 = vadd.f32 %v590_v6, %v543_v30 }
 0x148   : > { %v640_v9 = vadd.f32 %v610_v7, %v541_v62  ;;  %v1716_v10 = vadd.f32 %v633_v8, %v542_v5 }
 0x14d   : > { %v537_v11 = vpop.f32.mrf.mxu3 }
 0x14e   : > { %v709_v12 = vpop.f32.mrf.mxu0  ;;  %v545_v42 = vadd.f32 %v537_v11, %v446_v39 }
 0x14f   : > { %v613_v13 = vpop.f32.mrf.mxu1  ;;  %v636_v14 = vpop.f32.mrf.mxu2  ;;  %v1718_v15 = vadd.f32 %v709_v12, %v640_v9 }
 0x150   : > { %v643_v44 = vadd.f32 %v613_v13, %v544_v41  ;;  %v644_v51 = vadd.f32 %v636_v14, %v545_v42 }
 0x155   : > { %v686_v16 = vpop.f32.mrf.mxu3 }
 0x156   : > { %v712_v17 = vpop.f32.mrf.mxu0  ;;  %v738_v7 = vadd.f32 %v686_v16, %v1714_v3  ;;  %v1046_v3 = vpop.permute.xlu2 %1045 }
 0x157   : > { %v1720_v18 = vpop.f32.mrf.mxu1  ;;  %v785_v19 = vpop.f32.mrf.mxu2  ;;  %v742_v52 = vadd.f32 %v712_v17, %v643_v44 }
 0x158   : > { %v837_v9 = vadd.f32 %v785_v19, %v738_v7  ;;  %v740_v19 = vadd.f32 %v1720_v18, %v1716_v10 }
 0x15d   : > { %v689_v20 = vpop.f32.mrf.mxu3 }
 0x15e   : > { %v1722_v21 = vpop.f32.mrf.mxu0  ;;  %v741_v34 = vadd.f32 %v689_v20, %v642_v31 }
 0x15f   : > { %v735_v22 = vpop.f32.mrf.mxu1  ;;  %v788_v23 = vpop.f32.mrf.mxu2 }
 0x160   : > { %v840_v40 = vadd.f32 %v788_v23, %v741_v34  ;;  %v743_v54 = vadd.f32 %v735_v22, %v644_v51  ;;  %v839_v34 = vadd.f32 %v1722_v21, %v740_v19 }
 0x165   : > { %v1724_v25 = vpop.f32.mrf.mxu3 }
 0x166   : > { %v834_v26 = vpop.f32.mrf.mxu0 }
 0x167   : > { %v884_v27 = vpop.f32.mrf.mxu1  ;;  %v1726_v28 = vpop.f32.mrf.mxu2  ;;  %v842_v56 = vadd.f32 %v834_v26, %v743_v54 }
 0x168   : > { %v936_v14 = vadd.f32 %v884_v27, %v837_v9  ;;  %v838_v27 = vadd.f32 %v1724_v25, %v1718_v15 }
 0x16d   : > { %v811_v32 = vpop.f32.mrf.mxu3 }
 0x16e   : > { %v983_v33 = vpop.f32.mrf.mxu0  ;;  %v841_v45 = vadd.f32 %v811_v32, %v742_v52 }
 0x16f   : > { %v887_v35 = vpop.f32.mrf.mxu1  ;;  %v910_v36 = vpop.f32.mrf.mxu2  ;;  %v1035_v23 = vadd.f32 %v983_v33, %v936_v14 }
 0x170   : > { %v939_v37 = vadd.f32 %v887_v35, %v840_v40  ;;  %v940_v58 = vadd.f32 %v910_v36, %v841_v45  ;;  %v937_v40 = vadd.f32 %v1726_v28, %v838_v27 }
 0x171   : > { %v1048_v31 = vadd.f32 %v1046_v3, %v1035_v23 }
 0x175   : > { %v1728_v43 = vpop.f32.mrf.mxu3 }
 0x176   : > { %v986_v46 = vpop.f32.mrf.mxu0  ;;  %v938_v10 = vadd.f32 %v1728_v43, %v839_v34 }
 0x177   : > { %v1038_v48 = vadd.f32 %v986_v46, %v939_v37  ;;  %v1730_v49 = vpop.f32.mrf.mxu1  ;;  %v1732_v50 = vpop.f32.mrf.mxu2 }
 0x178   : > { %v1036_v15 = vadd.f32 %v1730_v49, %v937_v40  ;;  %v1037_v46 = vadd.f32 %v1732_v50, %v938_v10 }
 0x179   : > { %v1056_v53 = vadd.f32 %v1054_v47, %v1038_v48 }
 0x17a   : > { %v1049_v51 = vadd.f32 %v1046_v3, %v1036_v15 }
 0x17b   : > { %v1274_v55 = vmul.f32 -1.442695, %v1056_v53  ;;  %v1050_v53 = vadd.f32 %v1046_v3, %v1037_v46 }
 0x17d   : > { %1400 = vpow2.f32 %v1274_v55  ;;  %v933_v57 = vpop.f32.mrf.mxu3 }
 0x17e   : > { %v941_v59 = vadd.f32 %v933_v57, %v842_v56 }
 0x17f   : > { %v1009_v60 = vpop.f32.mrf.mxu1  ;;  %v1032_v61 = vpop.f32.mrf.mxu2 }
 0x180   : > { %v1039_v62 = vadd.f32 %v1009_v60, %v940_v58  ;;  %v1040_v63 = vadd.f32 %v1032_v61, %v941_v59 }
 0x182   : > { %v1057_v0 = vadd.f32 %v1054_v47, %v1039_v62  ;;  %v1058_v1 = vadd.f32 %v1054_v47, %v1040_v63 }
 0x183   : > { %v1401_v2 = vpop.eup %1400 }
 0x184   : > { %v1068_v4 = vadd.f32 1.0, %v1401_v2  ;;  %v1275_v5 = vmul.f32 -1.442695, %v1057_v0  ;;  %v1276_v6 = vmul.f32 -1.442695, %v1058_v1 }
 0x186   : > { %1402 = vrcp.f32 %v1068_v4  ;;  %v1082_v24 = vand.u32 2147483648, %v1068_v4  ;;  %v1080_v29 = vand.u32 2147483647, %v1068_v4  ;;  %vm1076_vm10 = vweird.f32 %v1068_v4 }
 0x187   : > { %1404 = vpow2.f32 %v1275_v5 }
 0x188   : > { %1406 = vpow2.f32 %v1276_v6  ;;  %v1083_v30 = vor.u32 1.1754944e-38, %v1082_v24  ;;  %vm1081_vm12 = vcmp.eq.f32.partialorder %v1080_v29, 8.507059e+37 }
 0x18c   : > { %v1403_v8 = vpop.eup %1402 }
 0x18d   : > { %v1405_v11 = vpop.eup %1404  ;;  %v1072_v12 = vmul.f32 %v1403_v8, %v1068_v4  ;;  %vm1077_vm9 = vweird.f32 %v1403_v8 }
 0x18e   : > { %v1407_v13 = vpop.eup %1406  ;;  %v1069_v17 = vadd.f32 1.0, %v1405_v11  ;;  %vm1078_vm11 = vmor %vm1076_vm10, %vm1077_vm9 }
 0x18f   : > { %v1073_v20 = vsub.f32 1.0, %v1072_v12  ;;  %v1070_v22 = vadd.f32 1.0, %v1407_v13 }
 0x190   : > { %1408 = vrcp.f32 %v1069_v17  ;;  %v1097_v42 = vand.u32 2147483648, %v1069_v17  ;;  %v1095_v37 = vand.u32 2147483647, %v1069_v17  ;;  %vm1091_vm15 = vweird.f32 %v1069_v17 }
 0x191   : > { %v1074_v26 = vmul.f32 %v1403_v8, %v1073_v20  ;;  %1410 = vrcp.f32 %v1070_v22  ;;  %v1112_v44 = vand.u32 2147483648, %v1070_v22  ;;  %v1110_v43 = vand.u32 2147483647, %v1070_v22 }
 0x192   : > { %v1098_v48 = vor.u32 1.1754944e-38, %v1097_v42  ;;  %vm1106_vm1 = vweird.f32 %v1070_v22  ;;  %vm1096_vm2 = vcmp.eq.f32.partialorder %v1095_v37, 8.507059e+37 }
 0x193   : > { %v1075_v16 = vadd.f32 %v1403_v8, %v1074_v26  ;;  %v1113_v50 = vor.u32 1.1754944e-38, %v1112_v44  ;;  %vm1111_vm4 = vcmp.eq.f32.partialorder %v1110_v43, 8.507059e+37 }
 0x195   : > { %v1079_v32 = vsel %vm1078_vm11, %v1403_v8, %v1075_v16 }
 0x196   : > { %v1409_v33 = vpop.eup %1408  ;;  %v1084_v35 = vsel %vm1081_vm12, %v1083_v30, %v1079_v32 }
 0x197   : > { %v1411_v36 = vpop.eup %1410  ;;  %v1087_v38 = vmul.f32 %v1409_v33, %v1069_v17  ;;  %v1116_v39 = vmul.f32 %v1084_v35, %v1048_v31  ;;  %vm1092_vm13 = vweird.f32 %v1409_v33 }
 0x198   : > { %v1102_v18 = vmul.f32 %v1411_v36, %v1070_v22  ;;  %vm1107_vm14 = vweird.f32 %v1411_v36  ;;  %vm1093_vm0 = vmor %vm1091_vm15, %vm1092_vm13 }
 0x199   : > { %v1088_v41 = vsub.f32 1.0, %v1087_v38  ;;  %1119 = vst [vmem:[%s1746_s26] sm:$0xff] %v1116_v39  ;;  %vm1108_vm3 = vmor %vm1106_vm1, %vm1107_vm14 }
 0x19a   : > { %v1103_v25 = vsub.f32 1.0, %v1102_v18 }
 0x19b   : > { %v1089_v21 = vmul.f32 %v1409_v33, %v1088_v41 }
 0x19c   : > { %v1104_v28 = vmul.f32 %v1411_v36, %v1103_v25 }
 0x19d   : > { %v1090_v47 = vadd.f32 %v1409_v33, %v1089_v21 }
 0x19e   : > { %v1105_v49 = vadd.f32 %v1411_v36, %v1104_v28 }
 0x19f   : > { %v1094_v52 = vsel %vm1093_vm0, %v1409_v33, %v1090_v47 }
 0x1a0   : > { %v1099_v54 = vsel %vm1096_vm2, %v1098_v48, %v1094_v52  ;;  %v1109_v45 = vsel %vm1108_vm3, %v1411_v36, %v1105_v49 }
 0x1a1   : > { %v1114_v55 = vsel %vm1111_vm4, %v1113_v50, %v1109_v45  ;;  %v1117_v56 = vmul.f32 %v1099_v54, %v1049_v51 }
 0x1a2   : > { %v1118_v57 = vmul.f32 %v1114_v55, %v1050_v53 }
 0x1a3   : > { %1120 = vst [vmem:[%s1746_s26 + $0x8] sm:$0xff] %v1117_v56 }
 0x1a4   : > { %1121 = vst [vmem:[%s1746_s26 + $0x10] sm:$0xff] %v1118_v57 }
 0x1a5   : > { %1439 = shalt.err (!%p1436_p3)
}
 0x1a6   : > { %1284 = dma.vmem_to_hbm [thread:$0]  (%p1543_p5), %s1137_s29, 384, %s1139_s30, %s1123_s4  }
 0x1a7 PF: > { %p1290_p4 = scmp.ge.s32.totalorder %s1474_s15, 2  ;;  %s1150_s17 = sand.u32 1, %s1462_s12  }
 0x1a8   : > { %s1151_s19 = scalar_lea.sflag [#allocation3], %s1150_s17 }
 0x1a9   : > { %p1287_p7 = pnand %p1290_p4, %p1547_p6 }
 0x1ab   : > { %p1288_p8 = pneg %p1287_p7 }
 0x1ad   : > { %1457 = dma.done.wait (%p1288_p8), %s1151_s19, 384  }
 0x1ae   : > { %1459 = vsyncadd (%p1288_p8), %s1151_s19, 4294966912  ;;  %p13_p9 = scmp.ge.s32.totalorder %s1530_s18, 4   ;;  %s1792_s12 = smov %s1466_s13 }
 0x1af   : > { %s1793_s13 = smov %s1470_s14  ;;  %s1794_s14 = smov %s1541_s21 }
 0x1b0   : > { %s1795_s15 = smov %s1530_s18  ;;  %15 = sbr.rel (!%p13_p9) target bundleno = 3 (0x3), region = 75 }
 0x1b5   :  { %1157 = vsyncpa [#allocation3], 1 }
 0x1b6   :  { %1159 = vsyncpa [#allocation3 + $0x1], 1 }

</bundles_post_ra>
